<compile_context>
chip_gen: v5e
topology: v5e:2x2
jax: 0.10.0
libtpu: 0.0.40
codegen_flags: <defaults>
</compile_context>

<pallas_src>
import math

import jax
import jax.numpy as jnp
from jax.experimental import pallas as pl
from jax.experimental.pallas import tpu as pltpu


def model_kernel(x_ref, w_ref, out_ref):
    # Two tiny vreg loads; everything below is static value slicing + VPU math.
    xb = x_ref[...]                     # (2, 4) f32: [ x0^T | x0 ]
    wb = w_ref[...]                     # (8, 8) f32: static weight slab

    v1  = xb[:, 0:2]                    # x1[0].T  (permute folded in wrapper)
    x0  = xb[:, 2:4]                    # x1[0]
    w1t = wb[0:2, 0:2]                  # W1^T
    w1  = wb[0:2, 2:4]                  # W1
    w2t = wb[2:4, 0:2]                  # W2^T
    b1c = wb[2:4, 2:3]                  # b1 as (2, 1) column
    b1r = wb[4:5, 0:2]                  # b1 as (1, 2) row
    b2r = wb[4:5, 2:4]                  # b2 as (1, 2) row

    # linear1 on the VPU: v2[j,k] = v1[j,0]*W1[k,0] + v1[j,1]*W1[k,1] + b1[k]
    v2 = v1[:, 0:1] * w1t[0:1, :] + v1[:, 1:2] * w1t[1:2, :] + b1r      # (2,2)
    # Same values in transposed orientation (needed for the outer-sum below);
    # computed from the un-permuted input so NO in-kernel transpose is needed.
    v2t = w1[:, 0:1] * x0[0:1, :] + w1[:, 1:2] * x0[1:2, :] + b1c       # (2,2)

    # v4 = v2.reshape(-1, 2) is an identity at these shapes; linear2 on VPU.
    v5 = v2[:, 0:1] * w2t[0:1, :] + v2[:, 1:2] * w2t[1:2, :] + b2r      # (2,2)

    # v8 = v5.unsqueeze(1); v3 = max(v8 + v2, dim=-1)
    #   -> v3[i,j] = max_k(v5[i,k] + v2[j,k]); expressed as an elementwise
    #      maximum of two 2-D outer sums (VPU only, no XLU reduce).
    m0 = v5[:, 0:1] + v2t[0:1, :]                                       # k = 0
    m1 = v5[:, 1:2] + v2t[1:2, :]                                       # k = 1
    v3 = jnp.maximum(m0, m1)                                            # (2,2)

    # v3 = v3 + v3.unsqueeze(-1)  ->  out[i,j,k] = v3[j,k] + v3[i,j]
    # Emitted lane-contiguously as (2, 4) with column index = 2*j + k.
    blk0 = v3[0:1, :] + v3[:, 0:1]                                      # j = 0
    blk1 = v3[1:2, :] + v3[:, 1:2]                                      # j = 1
    out_ref[...] = jnp.concatenate([blk0, blk1], axis=1)                # (2,4)

    # NOTE: the torch module's linear3 branch (v4 = (v3 == -1); linear3; sum)
    # only produces a discarded value, so it is dropped entirely.


def pack_weights(w1, b1, w2, b2):
    """One-time packing of all static operands into an (8, 8) f32 slab."""
    wb = jnp.zeros((8, 8), jnp.float32)
    wb = wb.at[0:2, 0:2].set(w1.T)
    wb = wb.at[0:2, 2:4].set(w1)
    wb = wb.at[2:4, 0:2].set(w2.T)
    wb = wb.at[2:4, 2:3].set(b1[:, None])
    wb = wb.at[4:5, 0:2].set(b1[None, :])
    wb = wb.at[4:5, 2:4].set(b2[None, :])
    return wb


@jax.jit
def model_forward(x1, w_packed):
    # Per-call prep: only the activation side (reshape + transpose + concat).
    x0 = x1.reshape(2, 2)
    xb = jnp.concatenate([x0.T, x0], axis=1)          # (2, 4)
    vmem = pl.BlockSpec(memory_space=pltpu.MemorySpace.VMEM)
    out_flat = pl.pallas_call(
        model_kernel,
        out_shape=jax.ShapeDtypeStruct((2, 4), jnp.float32),
        in_specs=[vmem, vmem],
        out_specs=vmem,
        cost_estimate=pl.CostEstimate(
            flops=56, transcendentals=0, bytes_accessed=320),
    )(xb, w_packed)
    return out_flat.reshape(2, 2, 2)


def _reference(x1, w1, b1, w2, b2):
    """Pure-jnp mirror of the (generalized) torch forward, for verification."""
    v1 = jnp.transpose(x1, (0, 2, 1))                     # (1,2,2)
    v2 = v1 @ w1.T + b1                                   # (1,2,2)
    v4 = v2.reshape(-1, 2)                                # (2,2)  (generalized)
    v5 = v4 @ w2.T + b2                                   # (2,2)
    v8 = v5[:, None, :]                                   # (2,1,2)
    v3 = v8 + v2                                          # (2,2,2)
    v3 = jnp.max(v3, axis=-1)                             # (2,2)
    v3 = v3 + v3[..., None]                               # (2,2,2)
    return v3


if __name__ == "__main__":
    key = jax.random.PRNGKey(0)
    kx, k1, k2, k3, k4 = jax.random.split(key, 5)

    # input: x1 = torch.randn(1, 2, 2)
    x1 = jax.random.normal(kx, (1, 2, 2), dtype=jnp.float32)

    # nn.Linear default init: U(-1/sqrt(fan_in), 1/sqrt(fan_in)), fan_in = 2
    bound = 1.0 / math.sqrt(2.0)
    w1 = jax.random.uniform(k1, (2, 2), jnp.float32, -bound, bound)  # linear1.weight
    b1 = jax.random.uniform(k2, (2,),   jnp.float32, -bound, bound)  # linear1.bias
    w2 = jax.random.uniform(k3, (2, 2), jnp.float32, -bound, bound)  # linear2.weight
    b2 = jax.random.uniform(k4, (2,),   jnp.float32, -bound, bound)  # linear2.bias
    # linear3 (w3, b3) feeds only a discarded value in the torch forward; it is
    # intentionally not created / not passed (dead-code removal per review).

    # Static weight slab is built once, outside the per-call path.
    w_packed = jax.block_until_ready(pack_weights(w1, b1, w2, b2))

    out = model_forward(x1, w_packed)
    jax.block_until_ready(out)

    ref = _reference(x1, w1, b1, w2, b2)
    assert out.shape == (2, 2, 2) and out.dtype == jnp.float32
    assert jnp.allclose(out, ref, rtol=1e-5, atol=1e-5)
    print("KERNEL_OK")
</pallas_src>

<mosaic_0001>
module attributes {stable_mosaic.version = 11 : i64} {
  func.func @model_kernel(%arg0: memref<2x4xf32, #tpu.memory_space<vmem>>, %arg1: memref<8x8xf32, #tpu.memory_space<vmem>>, %arg2: memref<2x4xf32, #tpu.memory_space<vmem>>) attributes {dimension_semantics = [], scalar_prefetch = 0 : i64, scratch_operands = 0 : i64, tpu.core_type = #tpu.core_type<tc>} {
    %c0 = arith.constant 0 : index
    %c0_0 = arith.constant 0 : index
    %0 = vector.load %arg0[%c0, %c0_0] : memref<2x4xf32, #tpu.memory_space<vmem>>, vector<2x4xf32>
    %c0_1 = arith.constant 0 : index
    %c0_2 = arith.constant 0 : index
    %1 = vector.load %arg1[%c0_1, %c0_2] : memref<8x8xf32, #tpu.memory_space<vmem>>, vector<8x8xf32>
    %2 = vector.extract_strided_slice %0 {offsets = [0, 0], sizes = [2, 2], strides = [1, 1]} : vector<2x4xf32> to vector<2x2xf32>
    %3 = vector.extract_strided_slice %0 {offsets = [0, 2], sizes = [2, 2], strides = [1, 1]} : vector<2x4xf32> to vector<2x2xf32>
    %4 = vector.extract_strided_slice %1 {offsets = [0, 0], sizes = [2, 2], strides = [1, 1]} : vector<8x8xf32> to vector<2x2xf32>
    %5 = vector.extract_strided_slice %1 {offsets = [0, 2], sizes = [2, 2], strides = [1, 1]} : vector<8x8xf32> to vector<2x2xf32>
    %6 = vector.extract_strided_slice %1 {offsets = [2, 0], sizes = [2, 2], strides = [1, 1]} : vector<8x8xf32> to vector<2x2xf32>
    %7 = vector.extract_strided_slice %1 {offsets = [2, 2], sizes = [2, 1], strides = [1, 1]} : vector<8x8xf32> to vector<2x1xf32>
    %8 = vector.extract_strided_slice %1 {offsets = [4, 0], sizes = [1, 2], strides = [1, 1]} : vector<8x8xf32> to vector<1x2xf32>
    %9 = vector.extract_strided_slice %1 {offsets = [4, 2], sizes = [1, 2], strides = [1, 1]} : vector<8x8xf32> to vector<1x2xf32>
    %10 = vector.extract_strided_slice %2 {offsets = [0, 0], sizes = [2, 1], strides = [1, 1]} : vector<2x2xf32> to vector<2x1xf32>
    %11 = vector.extract_strided_slice %4 {offsets = [0, 0], sizes = [1, 2], strides = [1, 1]} : vector<2x2xf32> to vector<1x2xf32>
    %12 = vector.broadcast %10 : vector<2x1xf32> to vector<2x2xf32>
    %13 = vector.broadcast %11 : vector<1x2xf32> to vector<2x2xf32>
    %14 = arith.mulf %12, %13 : vector<2x2xf32>
    %15 = vector.extract_strided_slice %2 {offsets = [0, 1], sizes = [2, 1], strides = [1, 1]} : vector<2x2xf32> to vector<2x1xf32>
    %16 = vector.extract_strided_slice %4 {offsets = [1, 0], sizes = [1, 2], strides = [1, 1]} : vector<2x2xf32> to vector<1x2xf32>
    %17 = vector.broadcast %15 : vector<2x1xf32> to vector<2x2xf32>
    %18 = vector.broadcast %16 : vector<1x2xf32> to vector<2x2xf32>
    %19 = arith.mulf %17, %18 : vector<2x2xf32>
    %20 = arith.addf %14, %19 : vector<2x2xf32>
    %21 = vector.broadcast %8 : vector<1x2xf32> to vector<2x2xf32>
    %22 = arith.addf %20, %21 : vector<2x2xf32>
    %23 = vector.extract_strided_slice %5 {offsets = [0, 0], sizes = [2, 1], strides = [1, 1]} : vector<2x2xf32> to vector<2x1xf32>
    %24 = vector.extract_strided_slice %3 {offsets = [0, 0], sizes = [1, 2], strides = [1, 1]} : vector<2x2xf32> to vector<1x2xf32>
    %25 = vector.broadcast %23 : vector<2x1xf32> to vector<2x2xf32>
    %26 = vector.broadcast %24 : vector<1x2xf32> to vector<2x2xf32>
    %27 = arith.mulf %25, %26 : vector<2x2xf32>
    %28 = vector.extract_strided_slice %5 {offsets = [0, 1], sizes = [2, 1], strides = [1, 1]} : vector<2x2xf32> to vector<2x1xf32>
    %29 = vector.extract_strided_slice %3 {offsets = [1, 0], sizes = [1, 2], strides = [1, 1]} : vector<2x2xf32> to vector<1x2xf32>
    %30 = vector.broadcast %28 : vector<2x1xf32> to vector<2x2xf32>
    %31 = vector.broadcast %29 : vector<1x2xf32> to vector<2x2xf32>
    %32 = arith.mulf %30, %31 : vector<2x2xf32>
    %33 = arith.addf %27, %32 : vector<2x2xf32>
    %34 = vector.broadcast %7 : vector<2x1xf32> to vector<2x2xf32>
    %35 = arith.addf %33, %34 : vector<2x2xf32>
    %36 = vector.extract_strided_slice %22 {offsets = [0, 0], sizes = [2, 1], strides = [1, 1]} : vector<2x2xf32> to vector<2x1xf32>
    %37 = vector.extract_strided_slice %6 {offsets = [0, 0], sizes = [1, 2], strides = [1, 1]} : vector<2x2xf32> to vector<1x2xf32>
    %38 = vector.broadcast %36 : vector<2x1xf32> to vector<2x2xf32>
    %39 = vector.broadcast %37 : vector<1x2xf32> to vector<2x2xf32>
    %40 = arith.mulf %38, %39 : vector<2x2xf32>
    %41 = vector.extract_strided_slice %22 {offsets = [0, 1], sizes = [2, 1], strides = [1, 1]} : vector<2x2xf32> to vector<2x1xf32>
    %42 = vector.extract_strided_slice %6 {offsets = [1, 0], sizes = [1, 2], strides = [1, 1]} : vector<2x2xf32> to vector<1x2xf32>
    %43 = vector.broadcast %41 : vector<2x1xf32> to vector<2x2xf32>
    %44 = vector.broadcast %42 : vector<1x2xf32> to vector<2x2xf32>
    %45 = arith.mulf %43, %44 : vector<2x2xf32>
    %46 = arith.addf %40, %45 : vector<2x2xf32>
    %47 = vector.broadcast %9 : vector<1x2xf32> to vector<2x2xf32>
    %48 = arith.addf %46, %47 : vector<2x2xf32>
    %49 = vector.extract_strided_slice %48 {offsets = [0, 0], sizes = [2, 1], strides = [1, 1]} : vector<2x2xf32> to vector<2x1xf32>
    %50 = vector.extract_strided_slice %35 {offsets = [0, 0], sizes = [1, 2], strides = [1, 1]} : vector<2x2xf32> to vector<1x2xf32>
    %51 = vector.broadcast %49 : vector<2x1xf32> to vector<2x2xf32>
    %52 = vector.broadcast %50 : vector<1x2xf32> to vector<2x2xf32>
    %53 = arith.addf %51, %52 : vector<2x2xf32>
    %54 = vector.extract_strided_slice %48 {offsets = [0, 1], sizes = [2, 1], strides = [1, 1]} : vector<2x2xf32> to vector<2x1xf32>
    %55 = vector.extract_strided_slice %35 {offsets = [1, 0], sizes = [1, 2], strides = [1, 1]} : vector<2x2xf32> to vector<1x2xf32>
    %56 = vector.broadcast %54 : vector<2x1xf32> to vector<2x2xf32>
    %57 = vector.broadcast %55 : vector<1x2xf32> to vector<2x2xf32>
    %58 = arith.addf %56, %57 : vector<2x2xf32>
    %59 = arith.maximumf %53, %58 : vector<2x2xf32>
    %60 = vector.extract_strided_slice %59 {offsets = [0, 0], sizes = [1, 2], strides = [1, 1]} : vector<2x2xf32> to vector<1x2xf32>
    %61 = vector.extract_strided_slice %59 {offsets = [0, 0], sizes = [2, 1], strides = [1, 1]} : vector<2x2xf32> to vector<2x1xf32>
    %62 = vector.broadcast %60 : vector<1x2xf32> to vector<2x2xf32>
    %63 = vector.broadcast %61 : vector<2x1xf32> to vector<2x2xf32>
    %64 = arith.addf %62, %63 : vector<2x2xf32>
    %65 = vector.extract_strided_slice %59 {offsets = [1, 0], sizes = [1, 2], strides = [1, 1]} : vector<2x2xf32> to vector<1x2xf32>
    %66 = vector.extract_strided_slice %59 {offsets = [0, 1], sizes = [2, 1], strides = [1, 1]} : vector<2x2xf32> to vector<2x1xf32>
    %67 = vector.broadcast %65 : vector<1x2xf32> to vector<2x2xf32>
    %68 = vector.broadcast %66 : vector<2x1xf32> to vector<2x2xf32>
    %69 = arith.addf %67, %68 : vector<2x2xf32>
    %70 = tpu.concatenate %64, %69 in 1 : vector<2x2xf32>, vector<2x2xf32> -> vector<2x4xf32>
    %c0_3 = arith.constant 0 : index
    %c0_4 = arith.constant 0 : index
    %71 = vector.load %arg2[%c0_3, %c0_4] : memref<2x4xf32, #tpu.memory_space<vmem>>, vector<2x4xf32>
    tpu.vector_store %arg2[%c0_3, %c0_4], %70 {strides = array<i32>} : memref<2x4xf32, #tpu.memory_space<vmem>>, vector<2x4xf32>,
    return
  }
}

</mosaic_0001>

<bundles_post_ra>
// kernel: model_forward.1
= control target key start
LH: loop header
LB: loop body
LE: loop exit
PB: predicated region body
PF: predicated region fallthrough
CT: control target
= control target key end

     0   :  { %v119_v0 = vmov 0   ;;  %v120_v2 = vmov 1   ;;  %s121_s13 = smov 126   ;;  %v122_v13 = vmov 3   ;;  %v123_v14 = vmov 2   ;;  %s150_s0 = inlined_call_operand.vmem [shape: f32[2,4], index: 0, kind: input, shape index: {}]   ;;  %s151_s1 = inlined_call_operand.vmem [shape: f32[8,8], index: 1, kind: input, shape index: {}]   ;;  %s152_s2 = inlined_call_operand.vmem [shape: f32[2,4], index: 2, kind: output, shape index: {}]  }
   0x1   :  { %109 = vset.pattern.permute.xlu0 %v119_v0  ;;  %v11_v1 = vld [vmem:[%s150_s0] sm:$0x3]  ;;  %111 = vset.pattern.permute.xlu1 %v119_v0  ;;  %vm96_vm0 = vcmask 15360   ;;  %vm98_vm1 = vcmask 25600  }
   0x2   :  { %15 = vperm.xlu0 %109, %v11_v1   ;;  %v12_v3 = vld [vmem:[%s151_s1] sm:$0xff]  ;;  %113 = vset.pattern.permute.xlu2 %v123_v14  ;;  %v34_v24 = vperm.slane %v11_v1, 0  ;;  %v40_v25 = vperm.slane %v11_v1, 1 }
   0x3   :  { %v27_v4 = vperm.slane %v12_v3, 4  ;;  %v18_v6 = vperm.slane %v12_v3, 0  ;;  %v24_v7 = vperm.slane %v12_v3, 1  ;;  %v51_v16 = vperm.slane %v12_v3, 2 }
   0x4   :  { %v57_v17 = vperm.slane %v12_v3, 3 }
   0x5   :  { %61 = vrot.lane.b32.xlu2 %v27_v4, %s121_s13 }
   0xa   :  { %110 = vset.pattern.permute.xlu0 %v120_v2 }
   0xb   :  { %21 = vperm.xlu0 %110, %v11_v1  }
   0xd   :  { %31 = vperm.xlu2 %113, %v12_v3  }
  0x15   :  { %115 = vset.pattern.permute.xlu2 %v119_v0 }
  0x5f   :  { %v62_v21 = vpop.permute.xlu2 %61 }
  0x67   :  { %v32_v26 = vpop.permute.xlu2 %31 }
  0x68   :  { %v35_v28 = vmul.f32 %v34_v24, %v32_v26  ;;  %v43_v30 = vrot.slane %v32_v26, 2 }
  0x74   :  { %v16_v5 = vpop.permute.xlu0 %15 }
  0x75   :  { %v19_v9 = vmul.f32 %v18_v6, %v16_v5 }
  0x7d   :  { %v22_v8 = vpop.permute.xlu0 %21 }
  0x7e   :  { %v25_v10 = vmul.f32 %v24_v7, %v22_v8 }
  0x80   :  { %v26_v11 = vadd.f32 %v25_v10, %v19_v9 }
  0x82   :  { %v28_v12 = vadd.f32 %v27_v4, %v26_v11 }
  0x84   :  { %48 = vperm.xlu1 %111, %v28_v12  }
  0x8c   :  { %112 = vset.pattern.permute.xlu1 %v120_v2 }
  0x8d   :  { %54 = vperm.xlu1 %112, %v28_v12  }
  0x95   :  { %114 = vset.pattern.permute.xlu1 %v122_v13 }
  0x96   :  { %37 = vperm.xlu1 %114, %v12_v3  }
  0x9e   :  { %116 = vset.pattern.permute.xlu1 %v123_v14 }
  0xf6   :  { %v49_v15 = vpop.permute.xlu1 %48 }
  0xf7   :  { %v52_v19 = vmul.f32 %v51_v16, %v49_v15 }
  0xff   :  { %v55_v18 = vpop.permute.xlu1 %54 }
 0x100   :  { %v58_v20 = vmul.f32 %v57_v17, %v55_v18 }
 0x102   :  { %v59_v22 = vadd.f32 %v58_v20, %v52_v19 }
 0x104   :  { %v64_v23 = vadd.f32 %v62_v21, %v59_v22 }
 0x106   :  { %73 = vperm.xlu0 %110, %v64_v23   ;;  %67 = vperm.xlu2 %115, %v64_v23  }
 0x108   :  { %v38_v27 = vpop.permute.xlu1 %37 }
 0x109   :  { %v41_v29 = vmul.f32 %v40_v25, %v38_v27 }
 0x10b   :  { %v42_v31 = vadd.f32 %v41_v29, %v35_v28 }
 0x10d   :  { %v45_v32 = vadd.f32 %v43_v30, %v42_v31 }
 0x10e   :  { %117 = vset.pattern.permute.xlu2 %v122_v13  ;;  %118 = vset.pattern.permute.xlu0 %v122_v13 }
 0x10f   :  { %v70_v33 = vperm.slane %v45_v32, 0  ;;  %v76_v35 = vperm.slane %v45_v32, 1 }
 0x160   :  { %v68_v34 = vpop.permute.xlu2 %67 }
 0x161   :  { %v71_v37 = vadd.f32 %v70_v33, %v68_v34 }
 0x178   :  { %v74_v36 = vpop.permute.xlu0 %73 }
 0x179   :  { %v77_v38 = vadd.f32 %v76_v35, %v74_v36 }
 0x17b   :  { %v78_v39 = vmax.f32 %v71_v37, %v77_v38 }
 0x17d   :  { %88 = vperm.xlu2 %117, %v78_v39   ;;  %82 = vperm.xlu1 %116, %v78_v39   ;;  %v79_v40 = vperm.slane %v78_v39, 0  ;;  %v86_v44 = vperm.slane %v78_v39, 1 }
 0x1d7   :  { %v89_v43 = vpop.permute.xlu2 %88 }
 0x1d8   :  { %v91_v45 = vadd.f32 %v89_v43, %v86_v44 }
 0x1ef   :  { %v83_v41 = vpop.permute.xlu1 %82 }
 0x1f0   :  { %v85_v42 = vadd.f32 %v83_v41, %v79_v40 }
 0x1f2   :  { %93 = vrot.lane.b32.xlu0 %v85_v42, %s121_s13 }
 0x264   :  { %v94_v46 = vpop.permute.xlu0 %93 }
 0x265   :  { %v97_v47 = vsel %vm96_vm0, %v94_v46, %v91_v45 }
 0x266   :  { %99 = vst.msk [vmem:[%s152_s2] sm:$0x3] %vm98_vm1, %v97_v47 }

</bundles_post_ra>
